<compile_context>
chip_gen: v7x
topology: tpu7x:2x2x1
jax: 0.10.0
libtpu: 0.0.40
codegen_flags: <defaults>
</compile_context>

<pallas_src>
import jax
import jax.numpy as jnp
from jax.experimental import pallas as pl
from jax.experimental.pallas import tpu as pltpu

C1 = 5        # conv output channels
K = 3         # conv kernel size (3x3), padding=1
KK = K * K    # taps per output pixel
N_OUT = 2     # FC output features
BN_MAX = 256  # batch block cap: taps block 9*256*HW*4 B ~ 2.25 MiB (x2 buffers) at HW=256


def net_kernel(xs_ref, cw_ref, cb_ref, fw_ref, fb_ref, out_ref):
    # xs_ref:  [9, bn, HW]   f32 VMEM  (tap k = dy*3+dx, sample, flattened spatial h*W+w)
    # cw_ref:  [C1*9]        f32 SMEM  (conv weight, flattened c*9 + dy*3 + dx)
    # cb_ref:  [C1]          f32 SMEM  (conv bias)
    # fw_ref:  [2*C1, HW]    f32 VMEM  (row o*C1 + c  <->  fc_w[o, c*HW : (c+1)*HW])
    # fb_ref:  [2]           f32 SMEM  (fc bias)
    # out_ref: [bn, 2]       f32 VMEM
    _, bn, hw = xs_ref.shape

    # Load the nine shifted input planes once; reused across all conv channels.
    taps = [xs_ref[k] for k in range(KK)]

    acc0 = None   # FC accumulator, output unit 0   [bn, HW]
    acc1 = None   # FC accumulator, output unit 1   [bn, HW]

    for c in range(C1):
        # Conv channel c: bias folded into the first MAC, then 8 scalar x vreg MACs (VPU).
        plane = cw_ref[c * KK] * taps[0] + cb_ref[c]
        for k in range(1, KK):
            plane = plane + cw_ref[c * KK + k] * taps[k]
        plane = jnp.maximum(plane, 0.0)                         # ReLU

        # Fold this channel straight into the FC accumulators (no flatten / concat).
        w0 = fw_ref[pl.ds(c, 1), :]                             # [1, HW] sublane-bcast
        w1 = fw_ref[pl.ds(C1 + c, 1), :]
        if c == 0:
            acc0 = plane * w0
            acc1 = plane * w1
        else:
            acc0 = acc0 + plane * w0
            acc1 = acc1 + plane * w1

    out0 = jnp.sum(acc0, axis=1, keepdims=True) + fb_ref[0]     # [bn, 1], XLU lane reduce
    out1 = jnp.sum(acc1, axis=1, keepdims=True) + fb_ref[1]     # [bn, 1]
    out_ref[...] = jnp.concatenate([out0, out1], axis=1)        # [bn, 2]


def net_forward(x, conv_w, conv_b, fc_w, fc_b):
    """x: [N, 1, H, W] f32 (NCHW, as in PyTorch). Returns [N, 2] f32."""
    N, Cin, H, W = x.shape
    assert Cin == 1
    HW = H * W

    # ---- batch tiling: sublane-aligned block, batch padded to a block multiple ----
    n8 = -(-N // 8) * 8                  # round batch up to a multiple of 8
    bn = min(n8, BN_MAX)                 # batch block
    n_pad = -(-N // bn) * bn             # padded batch (multiple of bn)

    # ---- host-side layout plumbing (zero FLOPs) ----
    xf = x[:, 0].astype(jnp.float32)                                     # [N, H, W]
    if n_pad != N:
        xf = jnp.pad(xf, ((0, n_pad - N), (0, 0), (0, 0)))               # zero samples
    xp = jnp.pad(xf, ((0, 0), (1, 1), (1, 1)))                           # [n_pad, H+2, W+2]
    taps = [xp[:, dy:dy + H, dx:dx + W].reshape(n_pad, HW)
            for dy in range(K) for dx in range(K)]
    xs = jnp.stack(taps, axis=0)                                         # [9, n_pad, HW]

    cw_flat = conv_w.reshape(C1 * KK).astype(jnp.float32)                # [45]
    cb = conv_b.astype(jnp.float32)                                      # [5]
    # PyTorch NCHW flatten order folded into the weight layout on the host:
    fw_perm = fc_w.astype(jnp.float32).reshape(N_OUT * C1, HW)           # [10, HW]
    fb = fc_b.astype(jnp.float32)                                        # [2]

    grid = (n_pad // bn,)

    out = pl.pallas_call(
        net_kernel,
        out_shape=jax.ShapeDtypeStruct((n_pad, N_OUT), jnp.float32),
        grid=grid,
        in_specs=[
            pl.BlockSpec((KK, bn, HW), lambda i: (0, i, 0)),             # taps (VMEM)
            pl.BlockSpec(memory_space=pltpu.MemorySpace.SMEM),           # conv weight
            pl.BlockSpec(memory_space=pltpu.MemorySpace.SMEM),           # conv bias
            pl.BlockSpec((N_OUT * C1, HW), lambda i: (0, 0)),            # fc weight (VMEM)
            pl.BlockSpec(memory_space=pltpu.MemorySpace.SMEM),           # fc bias
        ],
        out_specs=pl.BlockSpec((bn, N_OUT), lambda i: (i, 0)),
        compiler_params=pltpu.CompilerParams(
            dimension_semantics=("parallel",)),
    )(xs, cw_flat, cb, fw_perm, fb)

    return out[:N]


def reference_forward(x, conv_w, conv_b, fc_w, fc_b):
    # Pure-JAX reference for correctness checking.
    y = jax.lax.conv_general_dilated(
        x, conv_w, window_strides=(1, 1), padding="SAME",
        dimension_numbers=("NCHW", "OIHW", "NCHW"))
    y = y + conv_b.reshape(1, C1, 1, 1)
    y = jnp.maximum(y, 0.0)
    y = y.reshape(y.shape[0], -1)
    return y @ fc_w.T + fc_b


if __name__ == "__main__":
    win_size_actual = 16
    N, H, W = 2, win_size_actual, win_size_actual

    key = jax.random.PRNGKey(0)
    kx, kcw, kcb, kfw, kfb = jax.random.split(key, 5)

    x = jax.random.normal(kx, (N, 1, H, W), dtype=jnp.float32)

    # Deterministic parameter init (PyTorch-style uniform fan-in bounds).
    conv_bound = 1.0 / (1 * K * K) ** 0.5
    conv_w = jax.random.uniform(kcw, (C1, 1, K, K), jnp.float32,
                                -conv_bound, conv_bound)
    conv_b = jax.random.uniform(kcb, (C1,), jnp.float32, -conv_bound, conv_bound)

    fc_in = win_size_actual ** 2 * C1
    fc_bound = 1.0 / fc_in ** 0.5
    fc_w = jax.random.uniform(kfw, (2, fc_in), jnp.float32, -fc_bound, fc_bound)
    fc_b = jax.random.uniform(kfb, (2,), jnp.float32, -fc_bound, fc_bound)

    out = net_forward(x, conv_w, conv_b, fc_w, fc_b)
    out = jax.block_until_ready(out)

    ref = reference_forward(x, conv_w, conv_b, fc_w, fc_b)
    assert out.shape == (N, 2)
    assert jnp.allclose(out, ref, atol=1e-4, rtol=1e-4), (out, ref)

    print("KERNEL_OK")
</pallas_src>

<mosaic_0001>
module attributes {stable_mosaic.version = 11 : i64} {
  func.func @net_kernel(%arg0: i32, %arg1: memref<9x8x256xf32, #tpu.memory_space<vmem>>, %arg2: memref<45xf32, #tpu.memory_space<smem>>, %arg3: memref<5xf32, #tpu.memory_space<smem>>, %arg4: memref<10x256xf32, #tpu.memory_space<vmem>>, %arg5: memref<2xf32, #tpu.memory_space<smem>>, %arg6: memref<8x2xf32, #tpu.memory_space<vmem>>) attributes {dimension_semantics = [#tpu.dimension_semantics<parallel>], iteration_bounds = array<i64: 1>, scalar_prefetch = 0 : i64, scratch_operands = 0 : i64, tpu.core_type = #tpu.core_type<tc>, window_params = [{transform_indices = @transform_0, window_bounds = array<i64: 9, 8, 256>}, {transform_indices = @transform_1, window_bounds = array<i64: 45>}, {transform_indices = @transform_2, window_bounds = array<i64: 5>}, {pipeline_mode = #tpu.pipeline_mode<synchronous>, transform_indices = @transform_3, window_bounds = array<i64: 10, 256>}, {transform_indices = @transform_4, window_bounds = array<i64: 2>}, {transform_indices = @transform_5, window_bounds = array<i64: 8, 2>}]} {
    %c0 = arith.constant 0 : index
    %c0_0 = arith.constant 0 : index
    %c0_1 = arith.constant 0 : index
    %0 = vector.load %arg1[%c0, %c0_0, %c0_1] : memref<9x8x256xf32, #tpu.memory_space<vmem>>, vector<1x8x256xf32>
    %1 = vector.shape_cast %0 : vector<1x8x256xf32> to vector<8x256xf32>
    %c1 = arith.constant 1 : index
    %c0_2 = arith.constant 0 : index
    %c0_3 = arith.constant 0 : index
    %2 = vector.load %arg1[%c1, %c0_2, %c0_3] : memref<9x8x256xf32, #tpu.memory_space<vmem>>, vector<1x8x256xf32>
    %3 = vector.shape_cast %2 : vector<1x8x256xf32> to vector<8x256xf32>
    %c2 = arith.constant 2 : index
    %c0_4 = arith.constant 0 : index
    %c0_5 = arith.constant 0 : index
    %4 = vector.load %arg1[%c2, %c0_4, %c0_5] : memref<9x8x256xf32, #tpu.memory_space<vmem>>, vector<1x8x256xf32>
    %5 = vector.shape_cast %4 : vector<1x8x256xf32> to vector<8x256xf32>
    %c3 = arith.constant 3 : index
    %c0_6 = arith.constant 0 : index
    %c0_7 = arith.constant 0 : index
    %6 = vector.load %arg1[%c3, %c0_6, %c0_7] : memref<9x8x256xf32, #tpu.memory_space<vmem>>, vector<1x8x256xf32>
    %7 = vector.shape_cast %6 : vector<1x8x256xf32> to vector<8x256xf32>
    %c4 = arith.constant 4 : index
    %c0_8 = arith.constant 0 : index
    %c0_9 = arith.constant 0 : index
    %8 = vector.load %arg1[%c4, %c0_8, %c0_9] : memref<9x8x256xf32, #tpu.memory_space<vmem>>, vector<1x8x256xf32>
    %9 = vector.shape_cast %8 : vector<1x8x256xf32> to vector<8x256xf32>
    %c5 = arith.constant 5 : index
    %c0_10 = arith.constant 0 : index
    %c0_11 = arith.constant 0 : index
    %10 = vector.load %arg1[%c5, %c0_10, %c0_11] : memref<9x8x256xf32, #tpu.memory_space<vmem>>, vector<1x8x256xf32>
    %11 = vector.shape_cast %10 : vector<1x8x256xf32> to vector<8x256xf32>
    %c6 = arith.constant 6 : index
    %c0_12 = arith.constant 0 : index
    %c0_13 = arith.constant 0 : index
    %12 = vector.load %arg1[%c6, %c0_12, %c0_13] : memref<9x8x256xf32, #tpu.memory_space<vmem>>, vector<1x8x256xf32>
    %13 = vector.shape_cast %12 : vector<1x8x256xf32> to vector<8x256xf32>
    %c7 = arith.constant 7 : index
    %c0_14 = arith.constant 0 : index
    %c0_15 = arith.constant 0 : index
    %14 = vector.load %arg1[%c7, %c0_14, %c0_15] : memref<9x8x256xf32, #tpu.memory_space<vmem>>, vector<1x8x256xf32>
    %15 = vector.shape_cast %14 : vector<1x8x256xf32> to vector<8x256xf32>
    %c8 = arith.constant 8 : index
    %c0_16 = arith.constant 0 : index
    %c0_17 = arith.constant 0 : index
    %16 = vector.load %arg1[%c8, %c0_16, %c0_17] : memref<9x8x256xf32, #tpu.memory_space<vmem>>, vector<1x8x256xf32>
    %17 = vector.shape_cast %16 : vector<1x8x256xf32> to vector<8x256xf32>
    %c0_18 = arith.constant 0 : index
    %18 = memref.load %arg2[%c0_18] : memref<45xf32, #tpu.memory_space<smem>>
    %19 = vector.broadcast %18 : f32 to vector<8x256xf32>
    %20 = arith.mulf %19, %1 : vector<8x256xf32>
    %c0_19 = arith.constant 0 : index
    %21 = memref.load %arg3[%c0_19] : memref<5xf32, #tpu.memory_space<smem>>
    %22 = vector.broadcast %21 : f32 to vector<8x256xf32>
    %23 = arith.addf %20, %22 : vector<8x256xf32>
    %c1_20 = arith.constant 1 : index
    %24 = memref.load %arg2[%c1_20] : memref<45xf32, #tpu.memory_space<smem>>
    %25 = vector.broadcast %24 : f32 to vector<8x256xf32>
    %26 = arith.mulf %25, %3 : vector<8x256xf32>
    %27 = arith.addf %23, %26 : vector<8x256xf32>
    %c2_21 = arith.constant 2 : index
    %28 = memref.load %arg2[%c2_21] : memref<45xf32, #tpu.memory_space<smem>>
    %29 = vector.broadcast %28 : f32 to vector<8x256xf32>
    %30 = arith.mulf %29, %5 : vector<8x256xf32>
    %31 = arith.addf %27, %30 : vector<8x256xf32>
    %c3_22 = arith.constant 3 : index
    %32 = memref.load %arg2[%c3_22] : memref<45xf32, #tpu.memory_space<smem>>
    %33 = vector.broadcast %32 : f32 to vector<8x256xf32>
    %34 = arith.mulf %33, %7 : vector<8x256xf32>
    %35 = arith.addf %31, %34 : vector<8x256xf32>
    %c4_23 = arith.constant 4 : index
    %36 = memref.load %arg2[%c4_23] : memref<45xf32, #tpu.memory_space<smem>>
    %37 = vector.broadcast %36 : f32 to vector<8x256xf32>
    %38 = arith.mulf %37, %9 : vector<8x256xf32>
    %39 = arith.addf %35, %38 : vector<8x256xf32>
    %c5_24 = arith.constant 5 : index
    %40 = memref.load %arg2[%c5_24] : memref<45xf32, #tpu.memory_space<smem>>
    %41 = vector.broadcast %40 : f32 to vector<8x256xf32>
    %42 = arith.mulf %41, %11 : vector<8x256xf32>
    %43 = arith.addf %39, %42 : vector<8x256xf32>
    %c6_25 = arith.constant 6 : index
    %44 = memref.load %arg2[%c6_25] : memref<45xf32, #tpu.memory_space<smem>>
    %45 = vector.broadcast %44 : f32 to vector<8x256xf32>
    %46 = arith.mulf %45, %13 : vector<8x256xf32>
    %47 = arith.addf %43, %46 : vector<8x256xf32>
    %c7_26 = arith.constant 7 : index
    %48 = memref.load %arg2[%c7_26] : memref<45xf32, #tpu.memory_space<smem>>
    %49 = vector.broadcast %48 : f32 to vector<8x256xf32>
    %50 = arith.mulf %49, %15 : vector<8x256xf32>
    %51 = arith.addf %47, %50 : vector<8x256xf32>
    %c8_27 = arith.constant 8 : index
    %52 = memref.load %arg2[%c8_27] : memref<45xf32, #tpu.memory_space<smem>>
    %53 = vector.broadcast %52 : f32 to vector<8x256xf32>
    %54 = arith.mulf %53, %17 : vector<8x256xf32>
    %55 = arith.addf %51, %54 : vector<8x256xf32>
    %cst = arith.constant 0.000000e+00 : f32
    %56 = vector.broadcast %cst : f32 to vector<8x256xf32>
    %57 = arith.maximumf %55, %56 : vector<8x256xf32>
    %c0_28 = arith.constant 0 : index
    %c0_29 = arith.constant 0 : index
    %58 = vector.load %arg4[%c0_28, %c0_29] : memref<10x256xf32, #tpu.memory_space<vmem>>, vector<1x256xf32>
    %c5_30 = arith.constant 5 : index
    %c0_31 = arith.constant 0 : index
    %59 = vector.load %arg4[%c5_30, %c0_31] : memref<10x256xf32, #tpu.memory_space<vmem>>, vector<1x256xf32>
    %60 = vector.broadcast %58 : vector<1x256xf32> to vector<8x256xf32>
    %61 = arith.mulf %57, %60 : vector<8x256xf32>
    %62 = vector.broadcast %59 : vector<1x256xf32> to vector<8x256xf32>
    %63 = arith.mulf %57, %62 : vector<8x256xf32>
    %c9 = arith.constant 9 : index
    %64 = memref.load %arg2[%c9] : memref<45xf32, #tpu.memory_space<smem>>
    %65 = vector.broadcast %64 : f32 to vector<8x256xf32>
    %66 = arith.mulf %65, %1 : vector<8x256xf32>
    %c1_32 = arith.constant 1 : index
    %67 = memref.load %arg3[%c1_32] : memref<5xf32, #tpu.memory_space<smem>>
    %68 = vector.broadcast %67 : f32 to vector<8x256xf32>
    %69 = arith.addf %66, %68 : vector<8x256xf32>
    %c10 = arith.constant 10 : index
    %70 = memref.load %arg2[%c10] : memref<45xf32, #tpu.memory_space<smem>>
    %71 = vector.broadcast %70 : f32 to vector<8x256xf32>
    %72 = arith.mulf %71, %3 : vector<8x256xf32>
    %73 = arith.addf %69, %72 : vector<8x256xf32>
    %c11 = arith.constant 11 : index
    %74 = memref.load %arg2[%c11] : memref<45xf32, #tpu.memory_space<smem>>
    %75 = vector.broadcast %74 : f32 to vector<8x256xf32>
    %76 = arith.mulf %75, %5 : vector<8x256xf32>
    %77 = arith.addf %73, %76 : vector<8x256xf32>
    %c12 = arith.constant 12 : index
    %78 = memref.load %arg2[%c12] : memref<45xf32, #tpu.memory_space<smem>>
    %79 = vector.broadcast %78 : f32 to vector<8x256xf32>
    %80 = arith.mulf %79, %7 : vector<8x256xf32>
    %81 = arith.addf %77, %80 : vector<8x256xf32>
    %c13 = arith.constant 13 : index
    %82 = memref.load %arg2[%c13] : memref<45xf32, #tpu.memory_space<smem>>
    %83 = vector.broadcast %82 : f32 to vector<8x256xf32>
    %84 = arith.mulf %83, %9 : vector<8x256xf32>
    %85 = arith.addf %81, %84 : vector<8x256xf32>
    %c14 = arith.constant 14 : index
    %86 = memref.load %arg2[%c14] : memref<45xf32, #tpu.memory_space<smem>>
    %87 = vector.broadcast %86 : f32 to vector<8x256xf32>
    %88 = arith.mulf %87, %11 : vector<8x256xf32>
    %89 = arith.addf %85, %88 : vector<8x256xf32>
    %c15 = arith.constant 15 : index
    %90 = memref.load %arg2[%c15] : memref<45xf32, #tpu.memory_space<smem>>
    %91 = vector.broadcast %90 : f32 to vector<8x256xf32>
    %92 = arith.mulf %91, %13 : vector<8x256xf32>
    %93 = arith.addf %89, %92 : vector<8x256xf32>
    %c16 = arith.constant 16 : index
    %94 = memref.load %arg2[%c16] : memref<45xf32, #tpu.memory_space<smem>>
    %95 = vector.broadcast %94 : f32 to vector<8x256xf32>
    %96 = arith.mulf %95, %15 : vector<8x256xf32>
    %97 = arith.addf %93, %96 : vector<8x256xf32>
    %c17 = arith.constant 17 : index
    %98 = memref.load %arg2[%c17] : memref<45xf32, #tpu.memory_space<smem>>
    %99 = vector.broadcast %98 : f32 to vector<8x256xf32>
    %100 = arith.mulf %99, %17 : vector<8x256xf32>
    %101 = arith.addf %97, %100 : vector<8x256xf32>
    %cst_33 = arith.constant 0.000000e+00 : f32
    %102 = vector.broadcast %cst_33 : f32 to vector<8x256xf32>
    %103 = arith.maximumf %101, %102 : vector<8x256xf32>
    %c1_34 = arith.constant 1 : index
    %c0_35 = arith.constant 0 : index
    %104 = vector.load %arg4[%c1_34, %c0_35] : memref<10x256xf32, #tpu.memory_space<vmem>>, vector<1x256xf32>
    %c6_36 = arith.constant 6 : index
    %c0_37 = arith.constant 0 : index
    %105 = vector.load %arg4[%c6_36, %c0_37] : memref<10x256xf32, #tpu.memory_space<vmem>>, vector<1x256xf32>
    %106 = vector.broadcast %104 : vector<1x256xf32> to vector<8x256xf32>
    %107 = arith.mulf %103, %106 : vector<8x256xf32>
    %108 = arith.addf %61, %107 : vector<8x256xf32>
    %109 = vector.broadcast %105 : vector<1x256xf32> to vector<8x256xf32>
    %110 = arith.mulf %103, %109 : vector<8x256xf32>
    %111 = arith.addf %63, %110 : vector<8x256xf32>
    %c18 = arith.constant 18 : index
    %112 = memref.load %arg2[%c18] : memref<45xf32, #tpu.memory_space<smem>>
    %113 = vector.broadcast %112 : f32 to vector<8x256xf32>
    %114 = arith.mulf %113, %1 : vector<8x256xf32>
    %c2_38 = arith.constant 2 : index
    %115 = memref.load %arg3[%c2_38] : memref<5xf32, #tpu.memory_space<smem>>
    %116 = vector.broadcast %115 : f32 to vector<8x256xf32>
    %117 = arith.addf %114, %116 : vector<8x256xf32>
    %c19 = arith.constant 19 : index
    %118 = memref.load %arg2[%c19] : memref<45xf32, #tpu.memory_space<smem>>
    %119 = vector.broadcast %118 : f32 to vector<8x256xf32>
    %120 = arith.mulf %119, %3 : vector<8x256xf32>
    %121 = arith.addf %117, %120 : vector<8x256xf32>
    %c20 = arith.constant 20 : index
    %122 = memref.load %arg2[%c20] : memref<45xf32, #tpu.memory_space<smem>>
    %123 = vector.broadcast %122 : f32 to vector<8x256xf32>
    %124 = arith.mulf %123, %5 : vector<8x256xf32>
    %125 = arith.addf %121, %124 : vector<8x256xf32>
    %c21 = arith.constant 21 : index
    %126 = memref.load %arg2[%c21] : memref<45xf32, #tpu.memory_space<smem>>
    %127 = vector.broadcast %126 : f32 to vector<8x256xf32>
    %128 = arith.mulf %127, %7 : vector<8x256xf32>
    %129 = arith.addf %125, %128 : vector<8x256xf32>
    %c22 = arith.constant 22 : index
    %130 = memref.load %arg2[%c22] : memref<45xf32, #tpu.memory_space<smem>>
    %131 = vector.broadcast %130 : f32 to vector<8x256xf32>
    %132 = arith.mulf %131, %9 : vector<8x256xf32>
    %133 = arith.addf %129, %132 : vector<8x256xf32>
    %c23 = arith.constant 23 : index
    %134 = memref.load %arg2[%c23] : memref<45xf32, #tpu.memory_space<smem>>
    %135 = vector.broadcast %134 : f32 to vector<8x256xf32>
    %136 = arith.mulf %135, %11 : vector<8x256xf32>
    %137 = arith.addf %133, %136 : vector<8x256xf32>
    %c24 = arith.constant 24 : index
    %138 = memref.load %arg2[%c24] : memref<45xf32, #tpu.memory_space<smem>>
    %139 = vector.broadcast %138 : f32 to vector<8x256xf32>
    %140 = arith.mulf %139, %13 : vector<8x256xf32>
    %141 = arith.addf %137, %140 : vector<8x256xf32>
    %c25 = arith.constant 25 : index
    %142 = memref.load %arg2[%c25] : memref<45xf32, #tpu.memory_space<smem>>
    %143 = vector.broadcast %142 : f32 to vector<8x256xf32>
    %144 = arith.mulf %143, %15 : vector<8x256xf32>
    %145 = arith.addf %141, %144 : vector<8x256xf32>
    %c26 = arith.constant 26 : index
    %146 = memref.load %arg2[%c26] : memref<45xf32, #tpu.memory_space<smem>>
    %147 = vector.broadcast %146 : f32 to vector<8x256xf32>
    %148 = arith.mulf %147, %17 : vector<8x256xf32>
    %149 = arith.addf %145, %148 : vector<8x256xf32>
    %cst_39 = arith.constant 0.000000e+00 : f32
    %150 = vector.broadcast %cst_39 : f32 to vector<8x256xf32>
    %151 = arith.maximumf %149, %150 : vector<8x256xf32>
    %c2_40 = arith.constant 2 : index
    %c0_41 = arith.constant 0 : index
    %152 = vector.load %arg4[%c2_40, %c0_41] : memref<10x256xf32, #tpu.memory_space<vmem>>, vector<1x256xf32>
    %c7_42 = arith.constant 7 : index
    %c0_43 = arith.constant 0 : index
    %153 = vector.load %arg4[%c7_42, %c0_43] : memref<10x256xf32, #tpu.memory_space<vmem>>, vector<1x256xf32>
    %154 = vector.broadcast %152 : vector<1x256xf32> to vector<8x256xf32>
    %155 = arith.mulf %151, %154 : vector<8x256xf32>
    %156 = arith.addf %108, %155 : vector<8x256xf32>
    %157 = vector.broadcast %153 : vector<1x256xf32> to vector<8x256xf32>
    %158 = arith.mulf %151, %157 : vector<8x256xf32>
    %159 = arith.addf %111, %158 : vector<8x256xf32>
    %c27 = arith.constant 27 : index
    %160 = memref.load %arg2[%c27] : memref<45xf32, #tpu.memory_space<smem>>
    %161 = vector.broadcast %160 : f32 to vector<8x256xf32>
    %162 = arith.mulf %161, %1 : vector<8x256xf32>
    %c3_44 = arith.constant 3 : index
    %163 = memref.load %arg3[%c3_44] : memref<5xf32, #tpu.memory_space<smem>>
    %164 = vector.broadcast %163 : f32 to vector<8x256xf32>
    %165 = arith.addf %162, %164 : vector<8x256xf32>
    %c28 = arith.constant 28 : index
    %166 = memref.load %arg2[%c28] : memref<45xf32, #tpu.memory_space<smem>>
    %167 = vector.broadcast %166 : f32 to vector<8x256xf32>
    %168 = arith.mulf %167, %3 : vector<8x256xf32>
    %169 = arith.addf %165, %168 : vector<8x256xf32>
    %c29 = arith.constant 29 : index
    %170 = memref.load %arg2[%c29] : memref<45xf32, #tpu.memory_space<smem>>
    %171 = vector.broadcast %170 : f32 to vector<8x256xf32>
    %172 = arith.mulf %171, %5 : vector<8x256xf32>
    %173 = arith.addf %169, %172 : vector<8x256xf32>
    %c30 = arith.constant 30 : index
    %174 = memref.load %arg2[%c30] : memref<45xf32, #tpu.memory_space<smem>>
    %175 = vector.broadcast %174 : f32 to vector<8x256xf32>
    %176 = arith.mulf %175, %7 : vector<8x256xf32>
    %177 = arith.addf %173, %176 : vector<8x256xf32>
    %c31 = arith.constant 31 : index
    %178 = memref.load %arg2[%c31] : memref<45xf32, #tpu.memory_space<smem>>
    %179 = vector.broadcast %178 : f32 to vector<8x256xf32>
    %180 = arith.mulf %179, %9 : vector<8x256xf32>
    %181 = arith.addf %177, %180 : vector<8x256xf32>
    %c32 = arith.constant 32 : index
    %182 = memref.load %arg2[%c32] : memref<45xf32, #tpu.memory_space<smem>>
    %183 = vector.broadcast %182 : f32 to vector<8x256xf32>
    %184 = arith.mulf %183, %11 : vector<8x256xf32>
    %185 = arith.addf %181, %184 : vector<8x256xf32>
    %c33 = arith.constant 33 : index
    %186 = memref.load %arg2[%c33] : memref<45xf32, #tpu.memory_space<smem>>
    %187 = vector.broadcast %186 : f32 to vector<8x256xf32>
    %188 = arith.mulf %187, %13 : vector<8x256xf32>
    %189 = arith.addf %185, %188 : vector<8x256xf32>
    %c34 = arith.constant 34 : index
    %190 = memref.load %arg2[%c34] : memref<45xf32, #tpu.memory_space<smem>>
    %191 = vector.broadcast %190 : f32 to vector<8x256xf32>
    %192 = arith.mulf %191, %15 : vector<8x256xf32>
    %193 = arith.addf %189, %192 : vector<8x256xf32>
    %c35 = arith.constant 35 : index
    %194 = memref.load %arg2[%c35] : memref<45xf32, #tpu.memory_space<smem>>
    %195 = vector.broadcast %194 : f32 to vector<8x256xf32>
    %196 = arith.mulf %195, %17 : vector<8x256xf32>
    %197 = arith.addf %193, %196 : vector<8x256xf32>
    %cst_45 = arith.constant 0.000000e+00 : f32
    %198 = vector.broadcast %cst_45 : f32 to vector<8x256xf32>
    %199 = arith.maximumf %197, %198 : vector<8x256xf32>
    %c3_46 = arith.constant 3 : index
    %c0_47 = arith.constant 0 : index
    %200 = vector.load %arg4[%c3_46, %c0_47] : memref<10x256xf32, #tpu.memory_space<vmem>>, vector<1x256xf32>
    %c8_48 = arith.constant 8 : index
    %c0_49 = arith.constant 0 : index
    %201 = vector.load %arg4[%c8_48, %c0_49] : memref<10x256xf32, #tpu.memory_space<vmem>>, vector<1x256xf32>
    %202 = vector.broadcast %200 : vector<1x256xf32> to vector<8x256xf32>
    %203 = arith.mulf %199, %202 : vector<8x256xf32>
    %204 = arith.addf %156, %203 : vector<8x256xf32>
    %205 = vector.broadcast %201 : vector<1x256xf32> to vector<8x256xf32>
    %206 = arith.mulf %199, %205 : vector<8x256xf32>
    %207 = arith.addf %159, %206 : vector<8x256xf32>
    %c36 = arith.constant 36 : index
    %208 = memref.load %arg2[%c36] : memref<45xf32, #tpu.memory_space<smem>>
    %209 = vector.broadcast %208 : f32 to vector<8x256xf32>
    %210 = arith.mulf %209, %1 : vector<8x256xf32>
    %c4_50 = arith.constant 4 : index
    %211 = memref.load %arg3[%c4_50] : memref<5xf32, #tpu.memory_space<smem>>
    %212 = vector.broadcast %211 : f32 to vector<8x256xf32>
    %213 = arith.addf %210, %212 : vector<8x256xf32>
    %c37 = arith.constant 37 : index
    %214 = memref.load %arg2[%c37] : memref<45xf32, #tpu.memory_space<smem>>
    %215 = vector.broadcast %214 : f32 to vector<8x256xf32>
    %216 = arith.mulf %215, %3 : vector<8x256xf32>
    %217 = arith.addf %213, %216 : vector<8x256xf32>
    %c38 = arith.constant 38 : index
    %218 = memref.load %arg2[%c38] : memref<45xf32, #tpu.memory_space<smem>>
    %219 = vector.broadcast %218 : f32 to vector<8x256xf32>
    %220 = arith.mulf %219, %5 : vector<8x256xf32>
    %221 = arith.addf %217, %220 : vector<8x256xf32>
    %c39 = arith.constant 39 : index
    %222 = memref.load %arg2[%c39] : memref<45xf32, #tpu.memory_space<smem>>
    %223 = vector.broadcast %222 : f32 to vector<8x256xf32>
    %224 = arith.mulf %223, %7 : vector<8x256xf32>
    %225 = arith.addf %221, %224 : vector<8x256xf32>
    %c40 = arith.constant 40 : index
    %226 = memref.load %arg2[%c40] : memref<45xf32, #tpu.memory_space<smem>>
    %227 = vector.broadcast %226 : f32 to vector<8x256xf32>
    %228 = arith.mulf %227, %9 : vector<8x256xf32>
    %229 = arith.addf %225, %228 : vector<8x256xf32>
    %c41 = arith.constant 41 : index
    %230 = memref.load %arg2[%c41] : memref<45xf32, #tpu.memory_space<smem>>
    %231 = vector.broadcast %230 : f32 to vector<8x256xf32>
    %232 = arith.mulf %231, %11 : vector<8x256xf32>
    %233 = arith.addf %229, %232 : vector<8x256xf32>
    %c42 = arith.constant 42 : index
    %234 = memref.load %arg2[%c42] : memref<45xf32, #tpu.memory_space<smem>>
    %235 = vector.broadcast %234 : f32 to vector<8x256xf32>
    %236 = arith.mulf %235, %13 : vector<8x256xf32>
    %237 = arith.addf %233, %236 : vector<8x256xf32>
    %c43 = arith.constant 43 : index
    %238 = memref.load %arg2[%c43] : memref<45xf32, #tpu.memory_space<smem>>
    %239 = vector.broadcast %238 : f32 to vector<8x256xf32>
    %240 = arith.mulf %239, %15 : vector<8x256xf32>
    %241 = arith.addf %237, %240 : vector<8x256xf32>
    %c44 = arith.constant 44 : index
    %242 = memref.load %arg2[%c44] : memref<45xf32, #tpu.memory_space<smem>>
    %243 = vector.broadcast %242 : f32 to vector<8x256xf32>
    %244 = arith.mulf %243, %17 : vector<8x256xf32>
    %245 = arith.addf %241, %244 : vector<8x256xf32>
    %cst_51 = arith.constant 0.000000e+00 : f32
    %246 = vector.broadcast %cst_51 : f32 to vector<8x256xf32>
    %247 = arith.maximumf %245, %246 : vector<8x256xf32>
    %c4_52 = arith.constant 4 : index
    %c0_53 = arith.constant 0 : index
    %248 = vector.load %arg4[%c4_52, %c0_53] : memref<10x256xf32, #tpu.memory_space<vmem>>, vector<1x256xf32>
    %c9_54 = arith.constant 9 : index
    %c0_55 = arith.constant 0 : index
    %249 = vector.load %arg4[%c9_54, %c0_55] : memref<10x256xf32, #tpu.memory_space<vmem>>, vector<1x256xf32>
    %250 = vector.broadcast %248 : vector<1x256xf32> to vector<8x256xf32>
    %251 = arith.mulf %247, %250 : vector<8x256xf32>
    %252 = arith.addf %204, %251 : vector<8x256xf32>
    %253 = vector.broadcast %249 : vector<1x256xf32> to vector<8x256xf32>
    %254 = arith.mulf %247, %253 : vector<8x256xf32>
    %255 = arith.addf %207, %254 : vector<8x256xf32>
    %cst_56 = arith.constant dense<0.000000e+00> : vector<8xf32>
    %256 = vector.multi_reduction <add>, %252, %cst_56 [1] : vector<8x256xf32> to vector<8xf32>
    %257 = vector.shape_cast %256 : vector<8xf32> to vector<8x1xf32>
    %c0_57 = arith.constant 0 : index
    %258 = memref.load %arg5[%c0_57] : memref<2xf32, #tpu.memory_space<smem>>
    %259 = vector.broadcast %258 : f32 to vector<8x1xf32>
    %260 = arith.addf %257, %259 : vector<8x1xf32>
    %cst_58 = arith.constant dense<0.000000e+00> : vector<8xf32>
    %261 = vector.multi_reduction <add>, %255, %cst_58 [1] : vector<8x256xf32> to vector<8xf32>
    %262 = vector.shape_cast %261 : vector<8xf32> to vector<8x1xf32>
    %c1_59 = arith.constant 1 : index
    %263 = memref.load %arg5[%c1_59] : memref<2xf32, #tpu.memory_space<smem>>
    %264 = vector.broadcast %263 : f32 to vector<8x1xf32>
    %265 = arith.addf %262, %264 : vector<8x1xf32>
    %266 = tpu.concatenate %260, %265 in 1 : vector<8x1xf32>, vector<8x1xf32> -> vector<8x2xf32>
    %c0_60 = arith.constant 0 : index
    %c0_61 = arith.constant 0 : index
    %267 = vector.load %arg6[%c0_60, %c0_61] : memref<8x2xf32, #tpu.memory_space<vmem>>, vector<8x2xf32>
    tpu.vector_store %arg6[%c0_60, %c0_61], %266 {strides = array<i32>} : memref<8x2xf32, #tpu.memory_space<vmem>>, vector<8x2xf32>,
    return
  }
  func.func @transform_0(%arg0: i32) -> (i32, i32, i32) {
    %c0_i32 = arith.constant 0 : i32
    %c0_i32_0 = arith.constant 0 : i32
    %c0_i32_1 = arith.constant 0 : i32
    return %c0_i32, %arg0, %c0_i32_0 : i32, i32, i32
  }
  func.func @transform_1(%arg0: i32) -> i32 {
    %c0_i32 = arith.constant 0 : i32
    %c0_i32_0 = arith.constant 0 : i32
    return %c0_i32 : i32
  }
  func.func @transform_2(%arg0: i32) -> i32 {
    %c0_i32 = arith.constant 0 : i32
    %c0_i32_0 = arith.constant 0 : i32
    return %c0_i32 : i32
  }
  func.func @transform_3(%arg0: i32) -> (i32, i32) {
    %c0_i32 = arith.constant 0 : i32
    %c0_i32_0 = arith.constant 0 : i32
    %c0_i32_1 = arith.constant 0 : i32
    return %c0_i32, %c0_i32_0 : i32, i32
  }
  func.func @transform_4(%arg0: i32) -> i32 {
    %c0_i32 = arith.constant 0 : i32
    %c0_i32_0 = arith.constant 0 : i32
    return %c0_i32 : i32
  }
  func.func @transform_5(%arg0: i32) -> (i32, i32) {
    %c0_i32 = arith.constant 0 : i32
    %c0_i32_0 = arith.constant 0 : i32
    return %arg0, %c0_i32 : i32, i32
  }
}

</mosaic_0001>

<bundles_post_ra>
// kernel: tpu_custom_call.1
= control target key start
LH: loop header
LB: loop body
LE: loop exit
PB: predicated region body
PF: predicated region fallthrough
CT: control target
= control target key end

     0   :  { %10 = vsyncpa [#allocation3], 0  ;;  %s1174_s0 = inlined_call_operand.hbm [shape: f32[9,8,256], index: 0, kind: input, shape index: {}]   ;;  %s1175_s1 = inlined_call_operand.vmem [shape: f32[45], index: 1, kind: input, shape index: {}]   ;;  %s1176_s2 = inlined_call_operand.vmem [shape: f32[5], index: 2, kind: input, shape index: {}]   ;;  %s1177_s3 = inlined_call_operand.hbm [shape: f32[10,256], index: 3, kind: input, shape index: {}]   ;;  %s1178_s4 = inlined_call_operand.vmem [shape: f32[2], index: 4, kind: input, shape index: {}]   ;;  %s1179_s5 = inlined_call_operand.vmem [shape: f32[8,2], index: 5, kind: output, shape index: {}]  }
   0x1   :  { %11 = vsyncpa [#allocation4], 0 }
   0x2   :  { %12 = vsyncpa [#allocation7], 0  ;;  %s42_s20 = sshll.u32 %s1176_s2, 4  ;;  %s43_s20 = int_to_ptr.vmem [resolvable:$true] %s42_s20 }
   0x3   :  { %13 = vsyncpa [#allocation9], 0  ;;  %s645_s21 = scalar_lea.vmem %s43_s20, 16  ;;  %p650_p1 = scmp.lt.s32.totalorder %s43_s20, %s43_s20 }
   0x4   :  { %p646_p0 = scmp.ne.s32.totalorder %s43_s20, %s645_s21  ;;  %p651_p2 = scmp.lt.s32.totalorder %s645_s21, %s645_s21 }
   0x6   :  { %p652_p3 = por %p651_p2, %p650_p1 }
   0x8   :  { %p653_p4 = pnand %p652_p3, %p646_p0 }
   0xa   :  { %656 = shalt.err (!%p653_p4)
}
   0xb   :  { %s735_s22 = smov [#allocation6]   ;;  %s736_s23 = smov [#allocation2]  }
   0xc   :  { %45 = dma.vmem_to_smem %s43_s20, 16, %s735_s22, [#allocation7]  }
   0xd   :  { %s19_s24 = sshll.u32 %s736_s23, 4  ;;  %s657_s27 = scalar_lea.hbm %s1174_s0, 2304  ;;  %s20_s24 = int_to_ptr.vmem [resolvable:$true] %s19_s24 }
   0xe   :  { %p658_p5 = scmp.ne.s32.totalorder %s1174_s0, %s657_s27  ;;  %p661_p6 = scmp.lt.u32.totalorder %s657_s27, %s1174_s0 }
  0x10   :  { %p663_p7 = pnand %p661_p6, %p658_p5 }
  0x12   :  { %666 = shalt.err (!%p663_p7)
}
  0x13   :  { %s667_s6 = scalar_lea.vmem %s20_s24, 2304  ;;  %p672_p9 = scmp.lt.s32.totalorder %s20_s24, %s20_s24 }
  0x14   :  { %p668_p8 = scmp.ne.s32.totalorder %s20_s24, %s667_s6  ;;  %p673_p10 = scmp.lt.s32.totalorder %s667_s6, %s667_s6 }
  0x16   :  { %p674_p11 = por %p673_p10, %p672_p9 }
  0x18   :  { %p675_p12 = pnand %p674_p11, %p668_p8 }
  0x1a   :  { %678 = shalt.err (!%p675_p12)
}
  0x1b   :  { %s737_s7 = smov 256   ;;  %s738_s8 = smov 16  }
  0x1c   :  { %25 = dma.hbm_to_vmem [thread:$0]  %s1174_s0, 2304, %s20_s24, [#allocation3], %s737_s7, %s737_s7, %s738_s8  }
  0x1d   :  { %s32_s13 = sshll.u32 %s1175_s1, 4  ;;  %s33_s13 = int_to_ptr.vmem [resolvable:$true] %s32_s13 }
  0x1e   :  { %s679_s14 = scalar_lea.vmem %s33_s13, 16  ;;  %p684_p0 = scmp.lt.s32.totalorder %s33_s13, %s33_s13 }
  0x1f   :  { %p680_p13 = scmp.ne.s32.totalorder %s33_s13, %s679_s14  ;;  %p685_p1 = scmp.lt.s32.totalorder %s679_s14, %s679_s14 }
  0x21   :  { %p686_p2 = por %p685_p1, %p684_p0 }
  0x23   :  { %p687_p3 = pnand %p686_p2, %p680_p13 }
  0x25   :  { %690 = shalt.err (!%p687_p3)
}
  0x26   :  { %s739_s15 = smov [#allocation5]   ;;  %s740_s16 = smov [#allocation8]  }
  0x27   :  { %35 = dma.vmem_to_smem %s33_s13, 16, %s739_s15, [#allocation4]  }
  0x28   :  { %s51_s17 = sshll.u32 %s740_s16, 4  ;;  %s64_s0 = sshll.u32 %s1178_s4, 4  ;;  %s52_s17 = int_to_ptr.vmem [resolvable:$true] %s51_s17  ;;  %s65_s0 = int_to_ptr.vmem [resolvable:$true] %s64_s0 }
  0x29   :  { %s691_s21 = scalar_lea.hbm %s1177_s3, 512 }
  0x2a   :  { %p692_p4 = scmp.ne.s32.totalorder %s1177_s3, %s691_s21  ;;  %p695_p5 = scmp.lt.u32.totalorder %s691_s21, %s1177_s3 }
  0x2c   :  { %p697_p6 = pnand %p695_p5, %p692_p4 }
  0x2e   :  { %700 = shalt.err (!%p697_p6)
}
  0x2f   :  { %s701_s26 = scalar_lea.vmem %s52_s17, 512  ;;  %p706_p8 = scmp.lt.s32.totalorder %s52_s17, %s52_s17 }
  0x30   :  { %p702_p7 = scmp.ne.s32.totalorder %s52_s17, %s701_s26  ;;  %p707_p9 = scmp.lt.s32.totalorder %s701_s26, %s701_s26 }
  0x32   :  { %p708_p10 = por %p707_p9, %p706_p8 }
  0x34   :  { %p709_p11 = pnand %p708_p10, %p702_p7 }
  0x36   :  { %712 = shalt.err (!%p709_p11)
}
  0x37   :  { %57 = dma.hbm_to_vmem [thread:$0]  %s1177_s3, 512, %s52_s17, [#allocation9], %s737_s7, %s737_s7, %s738_s8  }
  0x38   :  { %s713_s28 = scalar_lea.vmem %s65_s0, 16  ;;  %p718_p13 = scmp.lt.s32.totalorder %s65_s0, %s65_s0 }
  0x39   :  { %p714_p12 = scmp.ne.s32.totalorder %s65_s0, %s713_s28  ;;  %p719_p0 = scmp.lt.s32.totalorder %s713_s28, %s713_s28 }
  0x3b   :  { %p720_p1 = por %p719_p0, %p718_p13 }
  0x3d   :  { %p721_p2 = pnand %p720_p1, %p714_p12 }
  0x3f   :  { %724 = shalt.err (!%p721_p2)
}
  0x40   :  { %s741_s2 = smov [#allocation10]  }
  0x41   :  { %67 = dma.vmem_to_smem %s65_s0, 16, %s741_s2, [#allocation7]  }
  0x42   :  { %725 = dma.done.wait [#allocation3], 2304  }
  0x43   :  { %726 = vsyncadd [#allocation3], 4294964992 }
  0x44   :  { %727 = dma.done.wait [#allocation4], 16  }
  0x45   :  { %728 = vsyncadd [#allocation4], 4294967280 }
  0x46   :  { %729 = dma.done.wait [#allocation7], 16  }
  0x47   :  { %730 = vsyncadd [#allocation7], 4294967280 }
  0x48   :  { %731 = dma.done.wait [#allocation9], 512  }
  0x49   :  { %732 = vsyncadd [#allocation9], 4294966784 }
  0x4a   :  { %733 = dma.done.wait [#allocation7], 16  }
  0x4b   :  { %734 = vsyncadd [#allocation7], 4294967280 }
  0x4c   :  { %83 = sfence }
  0x4d   :  { %s110_s3 = sld [smem:[#allocation5]]  ;;  %v172_v0 = vlaneseq  ;;  %s589_s30 = sld [smem:[#allocation5 + $0x1]]  ;;  %v813_v2 = vld [vmem:[#allocation2] sm:$0xff]  ;;  %v815_v3 = vld [vmem:[#allocation2 + $0x8] sm:$0xff]  ;;  %v819_v4 = vld [vmem:[#allocation2 + $0x10] sm:$0xff]  ;;  %vm577_vm0 = vcmask 7168  }
  0x4e   :  { %s114_s29 = sld [smem:[#allocation6]]  ;;  %s811_s6 = sld [smem:[#allocation5 + $0x2]]  ;;  %v823_v5 = vld [vmem:[#allocation2 + $0x18] sm:$0xff]  ;;  %v831_v8 = vld [vmem:[#allocation2 + $0x20] sm:$0xff]  ;;  %v839_v12 = vld [vmem:[#allocation2 + $0x28] sm:$0xff]  ;;  %vm579_vm1 = vcmask 15360  }
  0x4f   :  { %v173_v1 = vshrl.u32 %v172_v0, 7  ;;  %s817_s7 = sld [smem:[#allocation5 + $0x3]]  ;;  %s821_s8 = sld [smem:[#allocation5 + $0x4]]  ;;  %v841_v14 = vld [vmem:[#allocation8] ss:$8 sm:$0x3] }
  0x50   :  { %s825_s9 = sld [smem:[#allocation5 + $0x5]]  ;;  %s827_s10 = sld [smem:[#allocation5 + $0x6]]  ;;  %v845_v15 = vld [vmem:[#allocation2 + $0x30] sm:$0xff]  ;;  %v847_v16 = vld [vmem:[#allocation2 + $0x38] sm:$0xff]  ;;  %v849_v17 = vld [vmem:[#allocation2 + $0x40] sm:$0xff] }
  0x51   :  { %v829_v7 = vsub.s32 0, %v173_v1  ;;  %s835_s11 = sld [smem:[#allocation5 + $0x7]]  ;;  %s837_s12 = sld [smem:[#allocation5 + $0x8]]  ;;  %v853_v22 = vld [vmem:[#allocation2 + $0x48] sm:$0xff]  ;;  %v859_v26 = vsub.s32 1, %v173_v1  ;;  %v865_v27 = vld [vmem:[#allocation2 + $0x50] sm:$0xff] }
  0x52   :  { %s843_s13 = sld [smem:[#allocation5 + $0x9]]  ;;  %s863_s15 = sld [smem:[#allocation5 + $0xa]]  ;;  %v867_v28 = vld [vmem:[#allocation2 + $0x58] sm:$0xff]  ;;  %v871_v33 = vld [vmem:[#allocation2 + $0x60] sm:$0xff]  ;;  %v873_v34 = vld [vmem:[#allocation2 + $0x68] sm:$0xff] }
  0x53   :  { %v111_v6 = vstv %s110_s3  ;;  %v119_v13 = vstv %s589_s30  ;;  %v175_v25 = vrot.slane %v841_v14, %v829_v7  ;;  %s861_s14 = sld [smem:[#allocation6 + $0x1]]  ;;  %s879_s16 = sld [smem:[#allocation5 + $0xb]]  ;;  %v883_v39 = vld [vmem:[#allocation2 + $0x70] sm:$0xff]  ;;  %v885_v40 = vld [vmem:[#allocation2 + $0x78] sm:$0xff]  ;;  %v889_v45 = vld [vmem:[#allocation2 + $0x80] sm:$0xff] }
  0x54   :  { %v112_v9 = vmul.f32 %v111_v6, %v813_v2  ;;  %v113_v10 = vmul.f32 %v111_v6, %v815_v3  ;;  %v115_v11 = vstv %s114_s29  ;;  %v120_v20 = vmul.f32 %v119_v13, %v819_v4  ;;  %s881_s17 = sld [smem:[#allocation5 + $0xc]]  ;;  %v891_v46 = vld [vmem:[#allocation2 + $0x88] sm:$0xff]  ;;  %s899_s18 = sld [smem:[#allocation5 + $0xd]] }
  0x55   :  { %v121_v21 = vmul.f32 %v119_v13, %v823_v5  ;;  %v125_v23 = vstv %s811_s6  ;;  %v131_v24 = vstv %s817_s7  ;;  %v137_v37 = vstv %s821_s8  ;;  %s901_s19 = sld [smem:[#allocation5 + $0xe]]  ;;  %s913_s0 = sld [smem:[#allocation5 + $0xf]] }
  0x56   :  { %v116_v18 = vadd.f32 %v115_v11, %v112_v9  ;;  %v117_v19 = vadd.f32 %v115_v11, %v113_v10  ;;  %v126_v31 = vmul.f32 %v125_v23, %v831_v8  ;;  %v127_v32 = vmul.f32 %v125_v23, %v839_v12  ;;  %s915_s20 = sld [smem:[#allocation5 + $0x10]]  ;;  %s923_s1 = sld [smem:[#allocation5 + $0x11]] }
  0x57   :  { %v132_v35 = vmul.f32 %v131_v24, %v845_v15  ;;  %v133_v36 = vmul.f32 %v131_v24, %v847_v16  ;;  %v143_v38 = vstv %s825_s9  ;;  %v138_v43 = vmul.f32 %v137_v37, %v849_v17  ;;  %s927_s21 = sld [smem:[#allocation5 + $0x12]]  ;;  %s933_s23 = sld [smem:[#allocation5 + $0x13]] }
  0x58   :  { %v122_v29 = vadd.f32 %v120_v20, %v116_v18  ;;  %v123_v30 = vadd.f32 %v121_v21, %v117_v19  ;;  %v139_v44 = vmul.f32 %v137_v37, %v853_v22  ;;  %v144_v47 = vmul.f32 %v143_v38, %v865_v27  ;;  %s931_s22 = sld [smem:[#allocation6 + $0x2]]  ;;  %s943_s24 = sld [smem:[#allocation5 + $0x14]] }
  0x59   :  { %v145_v48 = vmul.f32 %v143_v38, %v867_v28  ;;  %v149_v49 = vstv %s827_s10  ;;  %v155_v50 = vstv %s835_s11  ;;  %v161_v57 = vstv %s837_s12  ;;  %s945_s25 = sld [smem:[#allocation5 + $0x15]]  ;;  %s958_s26 = sld [smem:[#allocation5 + $0x16]] }
  0x5a   :  { %v128_v41 = vadd.f32 %v126_v31, %v122_v29  ;;  %v129_v42 = vadd.f32 %v127_v32, %v123_v30  ;;  %v150_v53 = vmul.f32 %v149_v49, %v871_v33  ;;  %v151_v54 = vmul.f32 %v149_v49, %v873_v34  ;;  %s960_s4 = sld [smem:[#allocation5 + $0x17]]  ;;  %s971_s27 = sld [smem:[#allocation5 + $0x18]] }
  0x5b   :  { %v156_v55 = vmul.f32 %v155_v50, %v883_v39  ;;  %v157_v56 = vmul.f32 %v155_v50, %v885_v40  ;;  %v198_v58 = vstv %s843_s13  ;;  %v162_v61 = vmul.f32 %v161_v57, %v889_v45  ;;  %s973_s28 = sld [smem:[#allocation5 + $0x19]]  ;;  %s992_s2 = sld [smem:[#allocation5 + $0x1a]] }
  0x5c   :  { %v134_v51 = vadd.f32 %v132_v35, %v128_v41  ;;  %v135_v52 = vadd.f32 %v133_v36, %v129_v42  ;;  %v163_v62 = vmul.f32 %v161_v57, %v891_v46  ;;  %v199_v63 = vmul.f32 %v198_v58, %v813_v2  ;;  %v949_v57 = vld [vmem:[#allocation8 + $0x1] ss:$8 sm:$0x3]  ;;  %s994_s3 = sld [smem:[#allocation5 + $0x1b]]  ;;  %s1006_s30 = sld [smem:[#allocation5 + $0x1c]] }
  0x5d   :  { %v200_v0 = vmul.f32 %v198_v58, %v815_v3  ;;  %v202_v1 = vstv %s861_s14  ;;  %v206_v6 = vstv %s863_s15  ;;  %v212_v20 = vstv %s879_s16  ;;  %s1004_s29 = sld [smem:[#allocation6 + $0x3]]  ;;  %s1017_s6 = sld [smem:[#allocation5 + $0x1d]] }
  0x5e   :  { %v140_v59 = vadd.f32 %v138_v43, %v134_v51  ;;  %v141_v60 = vadd.f32 %v139_v44, %v135_v52  ;;  %v207_v11 = vmul.f32 %v206_v6, %v819_v4  ;;  %v208_v13 = vmul.f32 %v206_v6, %v823_v5  ;;  %s1019_s7 = sld [smem:[#allocation5 + $0x1e]]  ;;  %s1034_s8 = sld [smem:[#allocation5 + $0x1f]] }
  0x5f   :  { %v203_v18 = vadd.f32 %v202_v1, %v199_v63  ;;  %v204_v19 = vadd.f32 %v202_v1, %v200_v0  ;;  %v218_v21 = vstv %s881_s17  ;;  %v213_v29 = vmul.f32 %v212_v20, %v831_v8  ;;  %s1036_s9 = sld [smem:[#allocation5 + $0x20]]  ;;  %s1050_s10 = sld [smem:[#allocation5 + $0x21]] }
  0x60   :  { %v146_v9 = vadd.f32 %v144_v47, %v140_v59  ;;  %v147_v10 = vadd.f32 %v145_v48, %v141_v60  ;;  %v214_v30 = vmul.f32 %v212_v20, %v839_v12  ;;  %v219_v35 = vmul.f32 %v218_v21, %v845_v15  ;;  %s1052_s11 = sld [smem:[#allocation5 + $0x22]]  ;;  %s1060_s12 = sld [smem:[#allocation5 + $0x23]] }
  0x61   :  { %v209_v31 = vadd.f32 %v207_v11, %v203_v18  ;;  %v210_v32 = vadd.f32 %v208_v13, %v204_v19  ;;  %v220_v36 = vmul.f32 %v218_v21, %v847_v16  ;;  %v224_v41 = vstv %s899_s18  ;;  %s1064_s13 = sld [smem:[#allocation5 + $0x24]]  ;;  %s1074_s15 = sld [smem:[#allocation5 + $0x25]] }
  0x62   :  { %v152_v23 = vadd.f32 %v150_v53, %v146_v9  ;;  %v153_v24 = vadd.f32 %v151_v54, %v147_v10  ;;  %v230_v42 = vstv %s901_s19  ;;  %v225_v47 = vmul.f32 %v224_v41, %v849_v17  ;;  %s1072_s14 = sld [smem:[#allocation6 + $0x4]]  ;;  %s1082_s16 = sld [smem:[#allocation5 + $0x26]] }
  0x63   :  { %v215_v43 = vadd.f32 %v213_v29, %v209_v31  ;;  %v216_v44 = vadd.f32 %v214_v30, %v210_v32  ;;  %v226_v48 = vmul.f32 %v224_v41, %v853_v22  ;;  %v231_v51 = vmul.f32 %v230_v42, %v865_v27  ;;  %s1084_s17 = sld [smem:[#allocation5 + $0x27]]  ;;  %s1095_s18 = sld [smem:[#allocation5 + $0x28]] }
  0x64   :  { %v158_v37 = vadd.f32 %v156_v55, %v152_v23  ;;  %v159_v38 = vadd.f32 %v157_v56, %v153_v24  ;;  %v232_v52 = vmul.f32 %v230_v42, %v867_v28  ;;  %v236_v55 = vstv %s913_s0  ;;  %s1103_s19 = sld [smem:[#allocation5 + $0x29]]  ;;  %s1105_s0 = sld [smem:[#allocation5 + $0x2a]] }
  0x65   :  { %v221_v53 = vadd.f32 %v219_v35, %v215_v43  ;;  %v222_v54 = vadd.f32 %v220_v36, %v216_v44  ;;  %v242_v56 = vstv %s915_s20  ;;  %v179_v60 = vrot.slane %v841_v14, %v859_v26  ;;  %s1113_s20 = sld [smem:[#allocation5 + $0x2b]] }
  0x66   :  { %v937_v49 = vadd.f32 %v162_v61, %v158_v37  ;;  %v939_v50 = vadd.f32 %v163_v62, %v159_v38  ;;  %v237_v61 = vmul.f32 %v236_v55, %v871_v33  ;;  %v238_v0 = vmul.f32 %v236_v55, %v873_v34 }
  0x67   :  { %v227_v62 = vadd.f32 %v225_v47, %v221_v53  ;;  %v228_v63 = vadd.f32 %v226_v48, %v222_v54  ;;  %v243_v1 = vmul.f32 %v242_v56, %v883_v39  ;;  %v244_v9 = vmul.f32 %v242_v56, %v885_v40 }
  0x68   :  { %v166_v58 = vmax.f32 %v937_v49, 0.0  ;;  %v167_v59 = vmax.f32 %v939_v50, 0.0  ;;  %v248_v10 = vstv %s923_s1  ;;  %v263_v11 = vrot.slane %v949_v57, %v829_v7  ;;  %s1125_s1 = sld [smem:[#allocation5 + $0x2c]] }
  0x69   :  { %v233_v13 = vadd.f32 %v231_v51, %v227_v62  ;;  %v234_v18 = vadd.f32 %v232_v52, %v228_v63  ;;  %v249_v19 = vmul.f32 %v248_v10, %v889_v45  ;;  %v250_v20 = vmul.f32 %v248_v10, %v891_v46 }
  0x6a   :  { %v182_v6 = vmul.f32 %v175_v25, %v166_v58  ;;  %v267_v14 = vrot.slane %v949_v57, %v859_v26  ;;  %v290_v25 = vstv %s927_s21  ;;  %v294_v21 = vstv %s931_s22  ;;  %s568_s21 = sld [smem:[#allocation10]]  ;;  %s637_s22 = sld [smem:[#allocation10 + $0x1]] }
  0x6b   :  { %v298_v23 = vstv %s933_s23  ;;  %v239_v24 = vadd.f32 %v237_v61, %v233_v13  ;;  %v240_v29 = vadd.f32 %v238_v0, %v234_v18  ;;  %v291_v30 = vmul.f32 %v290_v25, %v813_v2 }
  0x6c   :  { %v292_v31 = vmul.f32 %v290_v25, %v815_v3  ;;  %v299_v32 = vmul.f32 %v298_v23, %v819_v4  ;;  %v300_v35 = vmul.f32 %v298_v23, %v823_v5  ;;  %v304_v36 = vstv %s943_s24  ;;  %v1024_v23 = vld [vmem:[#allocation8 + $0x2] ss:$8 sm:$0x3] }
  0x6d   :  { %v310_v37 = vstv %s945_s25  ;;  %v245_v38 = vadd.f32 %v243_v1, %v239_v24  ;;  %v246_v41 = vadd.f32 %v244_v9, %v240_v29  ;;  %v295_v42 = vadd.f32 %v294_v21, %v291_v30 }
  0x6e   :  { %v296_v43 = vadd.f32 %v294_v21, %v292_v31  ;;  %v305_v44 = vmul.f32 %v304_v36, %v831_v8  ;;  %v306_v47 = vmul.f32 %v304_v36, %v839_v12  ;;  %v311_v48 = vmul.f32 %v310_v37, %v845_v15 }
  0x6f   :  { %v312_v51 = vmul.f32 %v310_v37, %v847_v16  ;;  %v996_v52 = vadd.f32 %v249_v19, %v245_v38  ;;  %v998_v53 = vadd.f32 %v250_v20, %v246_v41  ;;  %v301_v54 = vadd.f32 %v299_v32, %v295_v42 }
  0x70   :  { %v302_v55 = vadd.f32 %v300_v35, %v296_v43  ;;  %v316_v56 = vstv %s958_s26  ;;  %v322_v57 = vstv %s960_s4  ;;  %v328_v61 = vstv %s971_s27 }
  0x71   :  { %v334_v62 = vstv %s973_s28  ;;  %v253_v63 = vmax.f32 %v996_v52, 0.0  ;;  %v254_v0 = vmax.f32 %v998_v53, 0.0  ;;  %v307_v1 = vadd.f32 %v305_v44, %v301_v54 }
  0x72   :  { %v308_v9 = vadd.f32 %v306_v47, %v302_v55  ;;  %v1012_v10 = vmul.f32 %v179_v60, %v167_v59  ;;  %v317_v13 = vmul.f32 %v316_v56, %v849_v17  ;;  %v318_v18 = vmul.f32 %v316_v56, %v853_v22 }
  0x73   :  { %v323_v19 = vmul.f32 %v322_v57, %v865_v27  ;;  %v270_v20 = vmul.f32 %v263_v11, %v253_v63  ;;  %v313_v25 = vadd.f32 %v311_v48, %v307_v1  ;;  %v324_v60 = vmul.f32 %v322_v57, %v867_v28 }
  0x74   :  { %v314_v21 = vadd.f32 %v312_v51, %v308_v9  ;;  %v271_v24 = vmul.f32 %v267_v14, %v254_v0  ;;  %v329_v29 = vmul.f32 %v328_v61, %v871_v33  ;;  %v330_v30 = vmul.f32 %v328_v61, %v873_v34 }
  0x75   :  { %v335_v31 = vmul.f32 %v334_v62, %v883_v39  ;;  %v1031_v32 = vadd.f32 %v270_v20, %v182_v6  ;;  %v319_v11 = vadd.f32 %v317_v13, %v313_v25  ;;  %v336_v36 = vmul.f32 %v334_v62, %v885_v40 }
  0x76   :  { %v320_v35 = vadd.f32 %v318_v18, %v314_v21  ;;  %v340_v37 = vstv %s992_s2  ;;  %v355_v14 = vrot.slane %v1024_v23, %v829_v7  ;;  %v359_v38 = vrot.slane %v1024_v23, %v859_v26 }
  0x77   :  { %v382_v41 = vstv %s994_s3  ;;  %v325_v6 = vadd.f32 %v323_v19, %v319_v11  ;;  %v341_v43 = vmul.f32 %v340_v37, %v889_v45  ;;  %v342_v44 = vmul.f32 %v340_v37, %v891_v46 }
  0x78   :  { %v326_v42 = vadd.f32 %v324_v60, %v320_v35  ;;  %v383_v47 = vmul.f32 %v382_v41, %v813_v2  ;;  %v384_v48 = vmul.f32 %v382_v41, %v815_v3  ;;  %v386_v51 = vstv %s1004_s29 }
  0x79   :  { %v390_v54 = vstv %s1006_s30  ;;  %v331_v55 = vadd.f32 %v329_v29, %v325_v6  ;;  %v396_v9 = vstv %s1017_s6  ;;  %v402_v13 = vstv %s1019_s7 }
  0x7a   :  { %v332_v56 = vadd.f32 %v330_v30, %v326_v42  ;;  %v391_v57 = vmul.f32 %v390_v54, %v819_v4  ;;  %v392_v61 = vmul.f32 %v390_v54, %v823_v5  ;;  %v387_v62 = vadd.f32 %v386_v51, %v383_v47 }
  0x7b   :  { %v388_v1 = vadd.f32 %v386_v51, %v384_v48  ;;  %v337_v18 = vadd.f32 %v335_v31, %v331_v55  ;;  %v397_v20 = vmul.f32 %v396_v9, %v831_v8  ;;  %v398_v25 = vmul.f32 %v396_v9, %v839_v12 }
  0x7c   :  { %v338_v19 = vadd.f32 %v336_v36, %v332_v56  ;;  %v393_v21 = vadd.f32 %v391_v57, %v387_v62  ;;  %v403_v23 = vmul.f32 %v402_v13, %v845_v15  ;;  %v404_v29 = vmul.f32 %v402_v13, %v847_v16  ;;  %v440_v62 = vld [vmem:[#allocation8 + $0x3] ss:$8 sm:$0x3] }
  0x7d   :  { %v394_v60 = vadd.f32 %v392_v61, %v388_v1  ;;  %v1066_v30 = vadd.f32 %v341_v43, %v337_v18  ;;  %v408_v31 = vstv %s1034_s8  ;;  %v414_v35 = vstv %s1036_s9 }
  0x7e   :  { %v1068_v11 = vadd.f32 %v342_v44, %v338_v19  ;;  %v399_v36 = vadd.f32 %v397_v20, %v393_v21  ;;  %v409_v41 = vmul.f32 %v408_v31, %v849_v17  ;;  %v410_v6 = vmul.f32 %v408_v31, %v853_v22 }
  0x7f   :  { %v400_v37 = vadd.f32 %v398_v25, %v394_v60  ;;  %v345_v42 = vmax.f32 %v1066_v30, 0.0  ;;  %v415_v44 = vmul.f32 %v414_v35, %v865_v27  ;;  %v416_v47 = vmul.f32 %v414_v35, %v867_v28 }
  0x80   :  { %v346_v43 = vmax.f32 %v1068_v11, 0.0  ;;  %v405_v48 = vadd.f32 %v403_v23, %v399_v36  ;;  %v420_v54 = vstv %s1050_s10  ;;  %v426_v55 = vstv %s1052_s11 }
  0x81   :  { %v406_v51 = vadd.f32 %v404_v29, %v400_v37  ;;  %v273_v56 = vadd.f32 %v271_v24, %v1012_v10  ;;  %v362_v57 = vmul.f32 %v355_v14, %v345_v42  ;;  %v421_v13 = vmul.f32 %v420_v54, %v871_v33 }
  0x82   :  { %v363_v61 = vmul.f32 %v359_v38, %v346_v43  ;;  %v411_v1 = vadd.f32 %v409_v41, %v405_v48  ;;  %v422_v18 = vmul.f32 %v420_v54, %v873_v34  ;;  %v427_v24 = vmul.f32 %v426_v55, %v883_v39 }
  0x83   :  { %v412_v9 = vadd.f32 %v410_v6, %v406_v51  ;;  %v1098_v10 = vadd.f32 %v362_v57, %v1031_v32  ;;  %v428_v14 = vmul.f32 %v426_v55, %v885_v40  ;;  %v432_v38 = vstv %s1060_s12 }
  0x84   :  { %v417_v19 = vadd.f32 %v415_v44, %v411_v1  ;;  %v433_v25 = vmul.f32 %v432_v38, %v889_v45  ;;  %v447_v21 = vrot.slane %v440_v62, %v829_v7  ;;  %v434_v32 = vmul.f32 %v432_v38, %v891_v46 }
  0x85   :  { %v418_v20 = vadd.f32 %v416_v47, %v412_v9  ;;  %v474_v60 = vstv %s1064_s13  ;;  %v478_v23 = vstv %s1072_s14  ;;  %v482_v29 = vstv %s1074_s15 }
  0x86   :  { %v423_v31 = vadd.f32 %v421_v13, %v417_v19  ;;  %v475_v36 = vmul.f32 %v474_v60, %v813_v2  ;;  %v476_v37 = vmul.f32 %v474_v60, %v815_v3  ;;  %v483_v41 = vmul.f32 %v482_v29, %v819_v4 }
  0x87   :  { %v424_v35 = vadd.f32 %v422_v18, %v418_v20  ;;  %v484_v6 = vmul.f32 %v482_v29, %v823_v5  ;;  %v488_v44 = vstv %s1082_s16  ;;  %v494_v47 = vstv %s1084_s17 }
  0x88   :  { %v429_v48 = vadd.f32 %v427_v24, %v423_v31  ;;  %v479_v54 = vadd.f32 %v478_v23, %v475_v36  ;;  %v480_v55 = vadd.f32 %v478_v23, %v476_v37  ;;  %v489_v57 = vmul.f32 %v488_v44, %v831_v8  ;;  %v532_v31 = vld [vmem:[#allocation8 + $0x4] ss:$8 sm:$0x3] }
  0x89   :  { %v430_v51 = vadd.f32 %v428_v14, %v424_v35  ;;  %v490_v1 = vmul.f32 %v488_v44, %v839_v12  ;;  %v495_v2 = vmul.f32 %v494_v47, %v845_v15  ;;  %v496_v3 = vmul.f32 %v494_v47, %v847_v16  ;;  %v170_v35 = vld [vmem:[#allocation8 + $0x5] ss:$8 sm:$0x3]  ;;  %v258_v44 = vld [vmem:[#allocation8 + $0x6] ss:$8 sm:$0x3] }
  0x8a   :  { %v435_v4 = vadd.f32 %v433_v25, %v429_v48  ;;  %v485_v9 = vadd.f32 %v483_v41, %v479_v54  ;;  %v486_v13 = vadd.f32 %v484_v6, %v480_v55  ;;  %v451_v18 = vrot.slane %v440_v62, %v859_v26  ;;  %v442_v55 = vld [vmem:[#allocation8 + $0x10] ss:$8 sm:$0x3] }
  0x8b   :  { %v1127_v5 = vadd.f32 %v434_v32, %v430_v51  ;;  %v500_v24 = vstv %s1095_s18  ;;  %v506_v14 = vstv %s1103_s19  ;;  %v512_v38 = vstv %s1105_s0 }
  0x8c   :  { %v437_v8 = vmax.f32 %v435_v4, 0.0  ;;  %v491_v19 = vadd.f32 %v489_v57, %v485_v9  ;;  %v492_v15 = vadd.f32 %v490_v1, %v486_v13  ;;  %v365_v20 = vadd.f32 %v363_v61, %v273_v56  ;;  %v534_v9 = vld [vmem:[#allocation8 + $0x11] ss:$8 sm:$0x3] }
  0x8d   :  { %v438_v12 = vmax.f32 %v1127_v5, 0.0  ;;  %v501_v16 = vmul.f32 %v500_v24, %v849_v17  ;;  %v502_v60 = vmul.f32 %v500_v24, %v853_v22  ;;  %v518_v25 = vstv %s1113_s20 }
  0x8e   :  { %v497_v32 = vadd.f32 %v495_v2, %v491_v19  ;;  %v498_v23 = vadd.f32 %v496_v3, %v492_v15  ;;  %v507_v29 = vmul.f32 %v506_v14, %v865_v27  ;;  %v508_v62 = vmul.f32 %v506_v14, %v867_v28 }
  0x8f   :  { %v454_v36 = vmul.f32 %v447_v21, %v437_v8  ;;  %v455_v37 = vmul.f32 %v451_v18, %v438_v12  ;;  %v513_v41 = vmul.f32 %v512_v38, %v871_v33  ;;  %v514_v56 = vmul.f32 %v512_v38, %v873_v34  ;;  %v350_v21 = vld [vmem:[#allocation8 + $0x7] ss:$8 sm:$0x3] }
  0x90   :  { %v503_v61 = vadd.f32 %v501_v16, %v497_v32  ;;  %v504_v17 = vadd.f32 %v502_v60, %v498_v23  ;;  %v519_v22 = vmul.f32 %v518_v25, %v883_v39  ;;  %v520_v6 = vmul.f32 %v518_v25, %v885_v40 }
  0x91   :  { %v524_v47 = vstv %s1125_s1  ;;  %v539_v27 = vrot.slane %v532_v31, %v829_v7  ;;  %v543_v28 = vrot.slane %v532_v31, %v859_v26  ;;  %v188_v48 = vrot.slane %v170_v35, %v829_v7 }
  0x92   :  { %v509_v51 = vadd.f32 %v507_v29, %v503_v61  ;;  %v510_v54 = vadd.f32 %v508_v62, %v504_v17  ;;  %v525_v33 = vmul.f32 %v524_v47, %v889_v45  ;;  %v526_v34 = vmul.f32 %v524_v47, %v891_v46 }
  0x93   :  { %v192_v39 = vrot.slane %v170_v35, %v859_v26  ;;  %v195_v40 = vmul.f32 %v188_v48, %v166_v58  ;;  %v278_v57 = vrot.slane %v258_v44, %v829_v7  ;;  %v282_v1 = vrot.slane %v258_v44, %v859_v26 }
  0x94   :  { %v515_v2 = vadd.f32 %v513_v41, %v509_v51  ;;  %v516_v3 = vadd.f32 %v514_v56, %v510_v54  ;;  %v370_v4 = vrot.slane %v350_v21, %v829_v7  ;;  %v374_v5 = vrot.slane %v350_v21, %v859_v26 }
  0x95   :  { %v196_v45 = vmul.f32 %v192_v39, %v167_v59  ;;  %v285_v46 = vmul.f32 %v278_v57, %v253_v63  ;;  %v286_v49 = vmul.f32 %v282_v1, %v254_v0  ;;  %v462_v58 = vrot.slane %v442_v55, %v829_v7 }
  0x96   :  { %v521_v13 = vadd.f32 %v519_v22, %v515_v2  ;;  %v522_v18 = vadd.f32 %v520_v6, %v516_v3  ;;  %v377_v24 = vmul.f32 %v370_v4, %v345_v42  ;;  %v378_v14 = vmul.f32 %v374_v5, %v346_v43 }
  0x97   :  { %v287_v38 = vadd.f32 %v285_v46, %v195_v40  ;;  %v288_v50 = vadd.f32 %v286_v49, %v196_v45  ;;  %v466_v59 = vrot.slane %v442_v55, %v859_v26  ;;  %v469_v52 = vmul.f32 %v462_v58, %v437_v8 }
  0x98   :  { %v527_v63 = vadd.f32 %v525_v33, %v521_v13  ;;  %v528_v19 = vadd.f32 %v526_v34, %v522_v18  ;;  %v554_v53 = vrot.slane %v534_v9, %v829_v7  ;;  %v558_v0 = vrot.slane %v534_v9, %v859_v26 }
  0x99   :  { %v379_v15 = vadd.f32 %v377_v24, %v287_v38  ;;  %v380_v16 = vadd.f32 %v378_v14, %v288_v50  ;;  %v470_v60 = vmul.f32 %v466_v59, %v438_v12  ;;  %v456_v30 = vadd.f32 %v454_v36, %v1098_v10 }
  0x9a   :  { %v457_v42 = vadd.f32 %v455_v37, %v365_v20  ;;  %v529_v25 = vmax.f32 %v527_v63, 0.0  ;;  %v530_v11 = vmax.f32 %v528_v19, 0.0  ;;  %v569_v12 = vstv %s568_s21 }
  0x9b   :  { %v471_v43 = vadd.f32 %v469_v52, %v379_v15  ;;  %v472_v32 = vadd.f32 %v470_v60, %v380_v16  ;;  %v575_v20 = vstv %s637_s22 }
  0x9c   :  { %v546_v23 = vmul.f32 %v539_v27, %v529_v25  ;;  %v547_v29 = vmul.f32 %v543_v28, %v530_v11  ;;  %v561_v62 = vmul.f32 %v554_v53, %v529_v25  ;;  %v562_v8 = vmul.f32 %v558_v0, %v530_v11 }
  0x9e   :  { %v548_v31 = vadd.f32 %v546_v23, %v456_v30  ;;  %v549_v35 = vadd.f32 %v547_v29, %v457_v42  ;;  %v563_v41 = vadd.f32 %v561_v62, %v471_v43  ;;  %v564_v7 = vadd.f32 %v562_v8, %v472_v32 }
  0xa0   :  { %v565_v56 = vadd.f32 %v549_v35, %v548_v31  ;;  %v571_v26 = vadd.f32 %v564_v7, %v563_v41 }
  0xa2   :  { %566 = vadd.xlane.f32.xlu0 %v565_v56 }
  0xa6   :  { %572 = vadd.xlane.f32.xlu0 %v571_v26 }
 0x12f   :  { %v567_v10 = vpop.xlane.xlu0 %566 }
 0x130   :  { %v570_v37 = vadd.f32 %v569_v12, %v567_v10 }
 0x133   :  { %v573_v36 = vpop.xlane.xlu0 %572 }
 0x134   :  { %v576_v61 = vadd.f32 %v575_v20, %v573_v36 }
 0x136   :  { %v578_v17 = vsel %vm577_vm0, %v570_v37, %v576_v61 }
 0x137   :  { %580 = vst.msk [vmem:[%s1179_s5] sm:$0xff] %vm579_vm1, %v578_v17 }
 0x138   :  { %585 = vsyncpa [#allocation3], 1 }
 0x139   :  { %586 = vsyncpa [#allocation9], 1 }
 0x13a   :  { %587 = vsyncpa [#allocation4], 1 }
 0x13b   :  { %588 = vsyncpa [#allocation7], 1 }

</bundles_post_ra>
